<compile_context>
chip_gen: v7x
topology: tpu7x:2x2x1
jax: 0.10.0
libtpu: 0.0.40
codegen_flags: <defaults>
</compile_context>

<pallas_src>
import jax
import jax.numpy as jnp
from jax import lax
from jax.experimental import pallas as pl
from jax.experimental.pallas import tpu as pltpu

CLS_NUM = 5     # histc uses bins=5, min=0, max=4 -> valid classes are 0..4
FEAT    = 32
BATCH   = 8


def center_loss_kernel(xs_ref, label_ref, center_ref, out_ref):
    xs      = xs_ref[...].astype(jnp.float32)       # (B, F)
    labels  = label_ref[...]                        # (B, 1) int32
    centers = center_ref[...].astype(jnp.float32)   # (C, F)

    B, _ = xs.shape
    C = centers.shape[0]

    # F.normalize(xs): x / max(||x||_2, 1e-12).  Exact sqrt + divide (no approx
    # EUP forms) -- the kernel is latency bound, so exactness is free and keeps
    # the result bit-close to the reference.
    sq_norm = jnp.sum(xs * xs, axis=1, keepdims=True)            # (B, 1)
    xs_n = xs / jnp.maximum(jnp.sqrt(sq_norm), 1e-12)            # (B, F)

    # One (B, C) one-hot from a single compare; histc and count_dis each become
    # one reduction (instead of 5 serially-dependent cross-sublane reduces).
    onehot = (labels == lax.broadcasted_iota(jnp.int32, (B, C), 1)
              ).astype(jnp.float32)                              # (B, C)
    counts = jnp.sum(onehot, axis=0, keepdims=True)              # (1, C) histc
    count_dis = jnp.sum(onehot * counts, axis=1, keepdims=True) + 1.0  # (B, 1)

    # Center row gather as an unrolled VPU select-accumulate (VALU slot is idle
    # here; do NOT "upgrade" this back to an MXU one-hot matmul at this size).
    cen_sel = jnp.zeros_like(xs_n)                               # (B, F)
    for c in range(C):
        cen_sel = cen_sel + onehot[:, c:c + 1] * centers[c:c + 1, :]

    diff = xs_n - cen_sel
    sq_sum = jnp.sum(diff * diff, axis=1, keepdims=True)         # (B, 1)
    per_sample = sq_sum / count_dis                              # exact divide

    # mean over batch; /B folded into an exact power-of-two constant multiply.
    out_ref[0] = jnp.sum(per_sample) * (1.0 / B)


def center_loss(xs, label, center):
    B, _ = xs.shape
    label2d = label.astype(jnp.int32).reshape(B, 1)

    out = pl.pallas_call(
        center_loss_kernel,
        out_shape=jax.ShapeDtypeStruct((1,), jnp.float32),
        # Gridless: whole arrays land in VMEM, no pipeline bookkeeping.
        in_specs=[
            pl.BlockSpec(memory_space=pltpu.MemorySpace.VMEM),   # xs
            pl.BlockSpec(memory_space=pltpu.MemorySpace.VMEM),   # labels
            pl.BlockSpec(memory_space=pltpu.MemorySpace.VMEM),   # centers
        ],
        # 1-D scalar result in SMEM (no masked VMEM store / padded writeback).
        out_specs=pl.BlockSpec(memory_space=pltpu.MemorySpace.SMEM),
    )(xs, label2d, center)
    return out[0]


def center_loss_ref(xs, label, center):
    # Pure-JAX reference mirroring the PyTorch forward (exact divides).
    norm = jnp.sqrt(jnp.sum(xs * xs, axis=1, keepdims=True))
    xs_n = xs / jnp.maximum(norm, 1e-12)
    cen = center[label]
    counts = jnp.sum(label[:, None] == jnp.arange(CLS_NUM)[None, :], axis=0)
    count_dis = counts[label].astype(jnp.float32) + 1.0
    return jnp.mean(jnp.sum((xs_n - cen) ** 2, axis=1) / count_dis)


if __name__ == "__main__":
    key = jax.random.PRNGKey(0)
    k_x, k_lbl, k_c = jax.random.split(key, 3)

    # Deterministic synthetic inputs / parameters (center ~ randn(cls_num, feature_num))
    xs     = jax.random.normal(k_x, (BATCH, FEAT), dtype=jnp.float32)
    label  = jax.random.randint(k_lbl, (BATCH,), 0, CLS_NUM, dtype=jnp.int32)
    center = jax.random.normal(k_c, (CLS_NUM, FEAT), dtype=jnp.float32)

    loss = center_loss(xs, label, center)
    loss = jax.block_until_ready(loss)

    ref = center_loss_ref(xs, label, center)
    # All divides are exact now; tolerance only needs to cover f32 reduction
    # reassociation, so it is much tighter than the previous rtol=2e-3.
    assert jnp.allclose(loss, ref, rtol=1e-5, atol=1e-6), (loss, ref)

    print("KERNEL_OK")
</pallas_src>

<mosaic_0001>
module attributes {stable_mosaic.version = 11 : i64} {
  func.func @center_loss_kernel(%arg0: memref<8x32xf32, #tpu.memory_space<vmem>>, %arg1: memref<8x1xi32, #tpu.memory_space<vmem>>, %arg2: memref<5x32xf32, #tpu.memory_space<vmem>>, %arg3: memref<1xf32, #tpu.memory_space<smem>>) attributes {dimension_semantics = [], scalar_prefetch = 0 : i64, scratch_operands = 0 : i64, tpu.core_type = #tpu.core_type<tc>} {
    %c0 = arith.constant 0 : index
    %c0_0 = arith.constant 0 : index
    %0 = vector.load %arg0[%c0, %c0_0] : memref<8x32xf32, #tpu.memory_space<vmem>>, vector<8x32xf32>
    %c0_1 = arith.constant 0 : index
    %c0_2 = arith.constant 0 : index
    %1 = vector.load %arg1[%c0_1, %c0_2] : memref<8x1xi32, #tpu.memory_space<vmem>>, vector<8x1xi32>
    %c0_3 = arith.constant 0 : index
    %c0_4 = arith.constant 0 : index
    %2 = vector.load %arg2[%c0_3, %c0_4] : memref<5x32xf32, #tpu.memory_space<vmem>>, vector<5x32xf32>
    %3 = arith.mulf %0, %0 : vector<8x32xf32>
    %cst = arith.constant dense<0.000000e+00> : vector<8xf32>
    %4 = vector.multi_reduction <add>, %3, %cst [1] : vector<8x32xf32> to vector<8xf32>
    %5 = vector.shape_cast %4 : vector<8xf32> to vector<8x1xf32>
    %6 = math.sqrt %5 : vector<8x1xf32>
    %cst_5 = arith.constant 9.99999996E-13 : f32
    %7 = vector.broadcast %cst_5 : f32 to vector<8x1xf32>
    %8 = arith.maximumf %6, %7 : vector<8x1xf32>
    %9 = vector.broadcast %8 : vector<8x1xf32> to vector<8x32xf32>
    %10 = arith.divf %0, %9 : vector<8x32xf32>
    %11 = tpu.iota {dimensions = array<i32: 1>} : vector<8x5xi32>
    %12 = vector.broadcast %1 : vector<8x1xi32> to vector<8x5xi32>
    %13 = arith.cmpi eq, %12, %11 : vector<8x5xi32>
    %14 = arith.extui %13 : vector<8x5xi1> to vector<8x5xi32>
    %15 = arith.sitofp %14 : vector<8x5xi32> to vector<8x5xf32>
    %cst_6 = arith.constant dense<0.000000e+00> : vector<5xf32>
    %16 = vector.multi_reduction <add>, %15, %cst_6 [0] : vector<8x5xf32> to vector<5xf32>
    %17 = vector.shape_cast %16 : vector<5xf32> to vector<1x5xf32>
    %18 = vector.broadcast %17 : vector<1x5xf32> to vector<8x5xf32>
    %19 = arith.mulf %15, %18 : vector<8x5xf32>
    %cst_7 = arith.constant dense<0.000000e+00> : vector<8xf32>
    %20 = vector.multi_reduction <add>, %19, %cst_7 [1] : vector<8x5xf32> to vector<8xf32>
    %21 = vector.shape_cast %20 : vector<8xf32> to vector<8x1xf32>
    %cst_8 = arith.constant 1.000000e+00 : f32
    %22 = vector.broadcast %cst_8 : f32 to vector<8x1xf32>
    %23 = arith.addf %21, %22 : vector<8x1xf32>
    %cst_9 = arith.constant 0.000000e+00 : f32
    %24 = vector.broadcast %cst_9 : f32 to vector<8x32xf32>
    %25 = vector.extract_strided_slice %15 {offsets = [0, 0], sizes = [8, 1], strides = [1, 1]} : vector<8x5xf32> to vector<8x1xf32>
    %26 = vector.extract_strided_slice %2 {offsets = [0, 0], sizes = [1, 32], strides = [1, 1]} : vector<5x32xf32> to vector<1x32xf32>
    %27 = vector.broadcast %25 : vector<8x1xf32> to vector<8x32xf32>
    %28 = vector.broadcast %26 : vector<1x32xf32> to vector<8x32xf32>
    %29 = arith.mulf %27, %28 : vector<8x32xf32>
    %30 = arith.addf %24, %29 : vector<8x32xf32>
    %31 = vector.extract_strided_slice %15 {offsets = [0, 1], sizes = [8, 1], strides = [1, 1]} : vector<8x5xf32> to vector<8x1xf32>
    %32 = vector.extract_strided_slice %2 {offsets = [1, 0], sizes = [1, 32], strides = [1, 1]} : vector<5x32xf32> to vector<1x32xf32>
    %33 = vector.broadcast %31 : vector<8x1xf32> to vector<8x32xf32>
    %34 = vector.broadcast %32 : vector<1x32xf32> to vector<8x32xf32>
    %35 = arith.mulf %33, %34 : vector<8x32xf32>
    %36 = arith.addf %30, %35 : vector<8x32xf32>
    %37 = vector.extract_strided_slice %15 {offsets = [0, 2], sizes = [8, 1], strides = [1, 1]} : vector<8x5xf32> to vector<8x1xf32>
    %38 = vector.extract_strided_slice %2 {offsets = [2, 0], sizes = [1, 32], strides = [1, 1]} : vector<5x32xf32> to vector<1x32xf32>
    %39 = vector.broadcast %37 : vector<8x1xf32> to vector<8x32xf32>
    %40 = vector.broadcast %38 : vector<1x32xf32> to vector<8x32xf32>
    %41 = arith.mulf %39, %40 : vector<8x32xf32>
    %42 = arith.addf %36, %41 : vector<8x32xf32>
    %43 = vector.extract_strided_slice %15 {offsets = [0, 3], sizes = [8, 1], strides = [1, 1]} : vector<8x5xf32> to vector<8x1xf32>
    %44 = vector.extract_strided_slice %2 {offsets = [3, 0], sizes = [1, 32], strides = [1, 1]} : vector<5x32xf32> to vector<1x32xf32>
    %45 = vector.broadcast %43 : vector<8x1xf32> to vector<8x32xf32>
    %46 = vector.broadcast %44 : vector<1x32xf32> to vector<8x32xf32>
    %47 = arith.mulf %45, %46 : vector<8x32xf32>
    %48 = arith.addf %42, %47 : vector<8x32xf32>
    %49 = vector.extract_strided_slice %15 {offsets = [0, 4], sizes = [8, 1], strides = [1, 1]} : vector<8x5xf32> to vector<8x1xf32>
    %50 = vector.extract_strided_slice %2 {offsets = [4, 0], sizes = [1, 32], strides = [1, 1]} : vector<5x32xf32> to vector<1x32xf32>
    %51 = vector.broadcast %49 : vector<8x1xf32> to vector<8x32xf32>
    %52 = vector.broadcast %50 : vector<1x32xf32> to vector<8x32xf32>
    %53 = arith.mulf %51, %52 : vector<8x32xf32>
    %54 = arith.addf %48, %53 : vector<8x32xf32>
    %55 = arith.subf %10, %54 : vector<8x32xf32>
    %56 = arith.mulf %55, %55 : vector<8x32xf32>
    %cst_10 = arith.constant dense<0.000000e+00> : vector<8xf32>
    %57 = vector.multi_reduction <add>, %56, %cst_10 [1] : vector<8x32xf32> to vector<8xf32>
    %58 = vector.shape_cast %57 : vector<8xf32> to vector<8x1xf32>
    %59 = arith.divf %58, %23 : vector<8x1xf32>
    %60 = vector.shape_cast %59 : vector<8x1xf32> to vector<1x8x1xf32>
    %cst_11 = arith.constant dense<0.000000e+00> : vector<1xf32>
    %61 = vector.multi_reduction <add>, %60, %cst_11 [1, 2] : vector<1x8x1xf32> to vector<1xf32>
    %62 = vector.shape_cast %61 : vector<1xf32> to vector<1x1x1xf32>
    %63 = vector.extract %62[0, 0, 0] : f32 from vector<1x1x1xf32>
    %cst_12 = arith.constant 1.250000e-01 : f32
    %64 = arith.mulf %63, %cst_12 : f32
    %c0_13 = arith.constant 0 : index
    %65 = memref.load %arg3[%c0_13] : memref<1xf32, #tpu.memory_space<smem>>
    memref.store %64, %arg3[%c0_13] : memref<1xf32, #tpu.memory_space<smem>>
    return
  }
}

</mosaic_0001>

<bundles_post_ra>
// kernel: tpu_custom_call.1
= control target key start
LH: loop header
LB: loop body
LE: loop exit
PB: predicated region body
PF: predicated region fallthrough
CT: control target
= control target key end

     0   :  { %v174_v1 = vmov 0   ;;  %s229_s0 = inlined_call_operand.vmem [shape: f32[8,32], index: 0, kind: input, shape index: {}]   ;;  %s230_s1 = inlined_call_operand.vmem [shape: s32[8,1], index: 1, kind: input, shape index: {}]   ;;  %s231_s2 = inlined_call_operand.vmem [shape: f32[5,32], index: 2, kind: input, shape index: {}]   ;;  %s232_s3 = inlined_call_operand.hbm [shape: f32[1], index: 3, kind: output, shape index: {}]  }
   0x1   :  { %v16_v0 = vld [vmem:[%s230_s1] sm:$0xff]  ;;  %149 = vset.pattern.permute.xlu0 %v174_v1  ;;  %150 = vset.pattern.permute.xlu1 %v174_v1 }
   0x2   :  { %8 = vsyncpa [#allocation3], 0  ;;  %36 = vperm.xlu0 %149, %v16_v0   ;;  %v175_v2 = vmov 4   ;;  %v207_v3 = vld [vmem:[%s229_s0] sm:$0xff]  ;;  %vm19_vm0 = vcmask 261120   ;;  %v33_v6 = vlaneseq  ;;  %v176_v9 = vmov 0.0  }
   0x3   :  { %v18_v4 = vmul.f32 %v207_v3, %v207_v3  ;;  %v177_v11 = vmov 1   ;;  %v178_v12 = vmov 2   ;;  %v179_v13 = vmov 3   ;;  %v17_v36 = vld [vmem:[%s231_s2] sm:$0x1f]  ;;  %s162_s19 = scalar_lea.hbm %s232_s3, 16 }
   0x4   :  { %v34_v7 = vand.u32 127, %v33_v6  ;;  %vm41_vm2 = vcmask 39936   ;;  %v60_v29 = vshrl.u32 %v33_v6, 7  ;;  %vm112_vm5 = vcmask 7168   ;;  %p163_p0 = scmp.ne.s32.totalorder %s232_s3, %s162_s19  ;;  %p166_p1 = scmp.lt.u32.totalorder %s162_s19, %s232_s3 }
   0x5   :  { %v20_v5 = vsel %vm19_vm0, %v18_v4, 0.0 }
   0x6   :  { %155 = vset.pattern.permute.xlu0 %v175_v2  ;;  %v71_v31 = vsub.s32 1, %v60_v29  ;;  %v61_v34 = vsub.s32 0, %v60_v29  ;;  %v81_v35 = vsub.s32 2, %v60_v29  ;;  %v91_v38 = vsub.s32 3, %v60_v29  ;;  %p168_p2 = pnand %p166_p1, %p163_p0 }
   0x7   :  { %v101_v44 = vsub.s32 4, %v60_v29 }
   0x8   :  { %v72_v37 = vrot.slane %v17_v36, %v71_v31  ;;  %v62_v40 = vrot.slane %v17_v36, %v61_v34  ;;  %v82_v41 = vrot.slane %v17_v36, %v81_v35  ;;  %v92_v43 = vrot.slane %v17_v36, %v91_v38 }
   0x9   :  { %v102_v50 = vrot.slane %v17_v36, %v101_v44 }
  0x21   :  { %21 = vadd.xlane.f32.xlu0 %v20_v5 }
  0x81   :  { %v37_v8 = vpop.permute.xlu0 %36 }
  0x82   :  { %vm38_vm1 = vcmp.eq.s32.totalorder %v37_v8, %v34_v7 }
  0x83   :  { %v139_v10 = vsel %vm38_vm1, 1.0, %v176_v9 }
  0x84   :  { %56 = vperm.xlu1 %150, %v139_v10   ;;  %v42_v14 = vsel %vm41_vm2, %v139_v10, 0.0 }
  0x85   :  { %v43_v15 = vrot.slane %v42_v14, 4 }
  0x87   :  { %v44_v16 = vadd.f32 %v43_v15, %v42_v14 }
  0x88   :  { %151 = vset.pattern.permute.xlu1 %v177_v11 }
  0x89   :  { %66 = vperm.xlu1 %151, %v139_v10   ;;  %v45_v17 = vrot.slane %v44_v16, 2 }
  0x8b   :  { %v46_v18 = vadd.f32 %v45_v17, %v44_v16 }
  0x8d   :  { %152 = vset.pattern.permute.xlu1 %v178_v12  ;;  %v47_v19 = vrot.slane %v46_v18, 1 }
  0x8e   :  { %76 = vperm.xlu1 %152, %v139_v10  }
  0x8f   :  { %v48_v20 = vadd.f32 %v47_v19, %v46_v18 }
  0x91   :  { %v49_v21 = vmul.f32 %v139_v10, %v48_v20 }
  0x92   :  { %153 = vset.pattern.permute.xlu1 %v179_v13 }
  0x93   :  { %86 = vperm.xlu1 %153, %v139_v10   ;;  %v50_v22 = vsel %vm41_vm2, %v49_v21, 0.0 }
  0x97   :  { %154 = vset.pattern.permute.xlu1 %v175_v2 }
  0x98   :  { %96 = vperm.xlu1 %154, %v139_v10  }
  0xae   :  { %v22_v23 = vpop.xlane.xlu0 %21 }
  0xaf   :  { %156 = vrsqrt.f32 %v22_v23  ;;  %vm25_vm3 = vcmp.eq.f32.partialorder %v22_v23, inf  ;;  %v28_v26 = vand.u32 2147483648, %v22_v23  ;;  %vm27_vm4 = vcmp.eq.f32.partialorder %v22_v23, 0.0 }
  0xb9   :  { %v157_v24 = vpop.eup %156 }
  0xba   :  { %v24_v25 = vmul.f32 %v157_v24, %v22_v23 }
  0xbc   :  { %51 = vadd.xlane.f32.xlu1 %v50_v22  ;;  %v26_v27 = vsel %vm25_vm3, %v22_v23, %v24_v25 }
  0xbd   :  { %v29_v30 = vsel %vm27_vm4, %v28_v26, %v26_v27 }
  0xbe   :  { %v30_v33 = vmax.f32 %v29_v30, 1e-12 }
  0xc0   :  { %158 = vrcp.f32 %v30_v33 }
  0xca   :  { %v159_v52 = vpop.eup %158 }
  0xcb   :  { %v32_v57 = vmul.f32 %v159_v52, %v207_v3 }
 0x103   :  { %v57_v28 = vpop.permute.xlu1 %56 }
 0x104   :  { %v63_v45 = vmul.f32 %v62_v40, %v57_v28 }
 0x108   :  { %v67_v32 = vpop.permute.xlu1 %66 }
 0x109   :  { %v73_v42 = vmul.f32 %v72_v37, %v67_v32 }
 0x10b   :  { %v74_v48 = vadd.f32 %v73_v42, %v63_v45 }
 0x10d   :  { %v77_v39 = vpop.permute.xlu1 %76 }
 0x10e   :  { %v83_v46 = vmul.f32 %v82_v41, %v77_v39 }
 0x110   :  { %v84_v51 = vadd.f32 %v83_v46, %v74_v48 }
 0x112   :  { %v87_v47 = vpop.permute.xlu1 %86 }
 0x113   :  { %v93_v49 = vmul.f32 %v92_v43, %v87_v47 }
 0x115   :  { %v94_v54 = vadd.f32 %v93_v49, %v84_v51 }
 0x117   :  { %v97_v53 = vpop.permute.xlu1 %96 }
 0x118   :  { %v103_v55 = vmul.f32 %v102_v50, %v97_v53 }
 0x11a   :  { %v104_v56 = vadd.f32 %v103_v55, %v94_v54 }
 0x11c   :  { %v105_v58 = vsub.f32 %v32_v57, %v104_v56 }
 0x11e   :  { %v106_v59 = vmul.f32 %v105_v58, %v105_v58 }
 0x120   :  { %v107_v60 = vsel %vm19_vm0, %v106_v59, 0.0 }
 0x121   :  { %108 = vadd.xlane.f32.xlu0 %v107_v60 }
 0x149   :  { %v52_v61 = vpop.xlane.xlu1 %51 }
 0x14a   :  { %v53_v62 = vadd.f32 1.0, %v52_v61 }
 0x14c   :  { %160 = vrcp.f32 %v53_v62 }
 0x156   :  { %v161_v63 = vpop.eup %160 }
 0x1ae   :  { %v109_v0 = vpop.xlane.xlu0 %108 }
 0x1af   :  { %v111_v1 = vmul.f32 %v161_v63, %v109_v0 }
 0x1b1   :  { %v113_v2 = vsel %vm112_vm5, %v111_v1, 0.0 }
 0x1b2   :  { %114 = vadd.xlane.f32.xlu0 %v113_v2 }
 0x23f   :  { %v115_v4 = vpop.xlane.xlu0 %114 }
 0x240   :  { %v116_v5 = vrot.slane %v115_v4, 4 }
 0x242   :  { %v117_v6 = vadd.f32 %v116_v5, %v115_v4 }
 0x244   :  { %v118_v7 = vrot.slane %v117_v6, 2 }
 0x246   :  { %v119_v8 = vadd.f32 %v118_v7, %v117_v6 }
 0x248   :  { %v120_v3 = vrot.slane %v119_v8, 1 }
 0x24a   :  { %v121_v9 = vadd.f32 %v120_v3, %v119_v8 }
 0x24c   :  { %140 = vpush %v121_v9 }
 0x27d   :  { %s141_s2 = spop %140 }
 0x27e   :  { %s123_s16 = smul.f32 0.125, %s141_s2 }
 0x280   :  { %125 = sst [smem:[#allocation2]] %s123_s16 }
 0x281   :  { %171 = shalt.err (!%p168_p2)
}
 0x282   :  { %s180_s24 = smov [#allocation2]  }
 0x283   :  { %133 = dma.smem_to_hbm %s180_s24, 16, %s232_s3, [#allocation3]  }
 0x284   :  { %172 = dma.done.wait [#allocation3], 16  }
 0x285   :  { %173 = vsyncadd [#allocation3], 4294967280 }
 0x286   :  { %137 = sfence }
 0x287   :  { %138 = vsyncpa [#allocation3], 1 }

</bundles_post_ra>
